<compile_context>
chip_gen: v6e
topology: v6e:2x2x1
jax: 0.10.0
libtpu: 0.0.40
codegen_flags: <defaults>
</compile_context>

<pallas_src>
import functools

import jax
import jax.numpy as jnp
from jax.experimental import pallas as pl
from jax.experimental.pallas import tpu as pltpu

TAU = 0.07          # temperature from Contrast2.__init__
EPS_NORM = 1e-12    # F.normalize eps
EPS_DEN = 1e-8      # denominator eps in the loss


# --------------------------------------------------------------------------- #
# Pallas kernel: one grid step == TB batch elements, per-batch partial losses.
# --------------------------------------------------------------------------- #
def _contrast_kernel(c_ref, p_ref, out_ref, *, inv_tau, inv_s, row_tile):
    TB, S, C = c_ref.shape
    P = p_ref.shape[1]
    eps2 = EPS_NORM * EPS_NORM

    # F.normalize(dim=-1): x / max(||x||, eps) == x * rsqrt(max(||x||^2, eps^2))
    # (rsqrt goes to the EUP slot -> no VPU divide passes).
    c = c_ref[...].astype(jnp.float32)
    cn = c * jax.lax.rsqrt(jnp.maximum(jnp.sum(c * c, axis=-1, keepdims=True), eps2))

    # positive term: sum_p cos(c_s, p_{p,s}) == sum_c(cn * sum_p pn).
    # Accumulate the normalized positives one P-slice at a time so only one
    # (TB, S, C) f32 intermediate is live (P is small and static) instead of
    # materializing the full (TB, P, S, C) f32 copy.
    pn_sum = jnp.zeros((TB, S, C), jnp.float32)
    for p in range(P):
        pv = p_ref[:, p].astype(jnp.float32)
        pn_sum = pn_sum + pv * jax.lax.rsqrt(
            jnp.maximum(jnp.sum(pv * pv, axis=-1, keepdims=True), eps2))
    pos = jnp.sum(cn * pn_sum, axis=-1) * inv_tau                       # (TB, S)

    # negative term: off-diagonal column sums of exp(cos_sim / tau).
    # bf16 MXU operands (single-pass matmul, f32 accumulation); the (S, S)
    # matrix is tiled along rows with a running column-sum accumulator so the
    # live f32 working set is only (TB, row_tile, S); exp is fused per tile
    # and the diagonal is masked out per tile (no exp(1/tau) subtraction ->
    # no catastrophic cancellation against the huge diagonal terms).
    cn_b = cn.astype(jnp.bfloat16)
    col_sum = jnp.zeros((TB, S), jnp.float32)
    for r in range(S // row_tile):
        rows = cn_b[:, r * row_tile:(r + 1) * row_tile]                 # (TB, rt, C)
        mt = jnp.einsum("brc,btc->brt", rows, cn_b,
                        preferred_element_type=jnp.float32)             # (TB, rt, S)
        rid = jax.lax.broadcasted_iota(jnp.int32, (row_tile, S), 0) + r * row_tile
        cid = jax.lax.broadcasted_iota(jnp.int32, (row_tile, S), 1)
        e = jnp.where((rid != cid)[None], jnp.exp(mt * inv_tau), 0.0)
        col_sum = col_sum + jnp.sum(e, axis=1)
    neg = col_sum                                                       # (TB, S)

    # -log(e^pos / (e^pos + neg + eps)) == logaddexp(pos, log(neg + eps)) - pos
    # (stable even when pos/tau is large; identical math to torch elsewhere).
    q = jnp.log(neg + EPS_DEN)
    m = jnp.maximum(pos, q)
    per_sample = m + jnp.log(1.0 + jnp.exp(-jnp.abs(pos - q))) - pos    # (TB, S)
    out_ref[...] = (jnp.sum(per_sample, axis=-1, keepdims=True) * inv_s)[None]


# --------------------------------------------------------------------------- #
# Tiling heuristics.
# --------------------------------------------------------------------------- #
def _pick_row_tile(S, cap=512):
    """Row-tile for the (S, S) similarity matrix; divisor of S, <= cap."""
    if S <= cap:
        return S
    for t in range(cap, 0, -1):
        if S % t == 0:
            return t
    return S


def _pick_tb(B, S, P, Cp, row_tile, budget_bytes):
    """Largest batch tile that (a) divides B, (b) keeps >= 2 grid steps when
    B >= 2 (so the 'parallel' axis shards across v7x's two TensorCores and
    the pipeline has something to overlap), and (c) fits a per-step VMEM
    budget (double-buffered bf16 inputs + f32 intermediates)."""
    for tb in range(B, 0, -1):
        if B % tb:
            continue
        if B >= 2 and B // tb < 2:
            continue
        in_bytes = 2 * tb * (1 + P) * S * Cp * 2                 # 2x dbl-buffer, bf16
        f32_bytes = tb * (3 * S * Cp + 2 * row_tile * S + 8 * S) * 4
        if in_bytes + f32_bytes <= budget_bytes or tb == 1:
            return tb
    return 1


def contrast2_pallas(c_sel, p_sel, tau=TAU):
    """c_sel: (B, S, C); p_sel: (B, P, S, C) (bf16 or f32) -> scalar f32 loss."""
    B, S, C = c_sel.shape
    P = p_sel.shape[1]

    # Lane-dense channel dim: zero-pad C to a multiple of 128 (fills the MXU
    # contraction width and every 128-lane vreg; norms/dots unchanged).
    Cp = ((C + 127) // 128) * 128
    if Cp != C:
        c_sel = jnp.pad(c_sel, ((0, 0), (0, 0), (0, Cp - C)))
        p_sel = jnp.pad(p_sel, ((0, 0), (0, 0), (0, 0), (0, Cp - C)))

    row_tile = _pick_row_tile(S)
    TB = _pick_tb(B, S, P, Cp, row_tile, budget_bytes=40 * 1024 * 1024)
    nb = B // TB

    kernel = functools.partial(_contrast_kernel, inv_tau=1.0 / tau, inv_s=1.0 / S,
                               row_tile=row_tile)
    per_batch = pl.pallas_call(
        kernel,
        out_shape=jax.ShapeDtypeStruct((nb, TB, 1), jnp.float32),
        grid_spec=pltpu.PrefetchScalarGridSpec(
            num_scalar_prefetch=0,
            grid=(nb,),
            in_specs=[
                pl.BlockSpec((TB, S, Cp), lambda i: (i, 0, 0)),
                pl.BlockSpec((TB, P, S, Cp), lambda i: (i, 0, 0, 0)),
            ],
            out_specs=pl.BlockSpec((1, TB, 1), lambda i: (i, 0, 0)),
        ),
        compiler_params=pltpu.CompilerParams(
            dimension_semantics=("parallel",),
            vmem_limit_bytes=48 * 1024 * 1024,   # explicit: safe on v7x's 64 MiB
        ),
    )(c_sel, p_sel)
    return jnp.sum(per_batch) / B


# --------------------------------------------------------------------------- #
# JAX glue: NCHW -> (B, HW, C), hard-pixel sampling (replaces nonzero/randperm).
# --------------------------------------------------------------------------- #
def select_hard_samples(proj_list, idx, mask, sample_num, key):
    # TODO(synk): torch.nonzero + randperm give variable-length per-image sampling;
    # here exactly `sample_num` hard pixels are drawn per image (mask must leave
    # >= sample_num uncertain pixels per image) via top_k of masked uniform scores.
    B, C, H, W = proj_list[idx].shape
    HW = H * W
    flat = [jnp.transpose(p, (0, 2, 3, 1)).reshape(B, HW, C) for p in proj_list]
    curr = flat[idx]                                                   # (B, HW, C)
    pos = jnp.stack([flat[i] for i in range(len(flat)) if i != idx], axis=1)  # (B,P,HW,C)

    fn_mask = 1 - mask.reshape(B, HW).astype(jnp.int32)
    scores = jnp.where(fn_mask == 1, jax.random.uniform(key, (B, HW)), -1.0)
    _, idx_sel = jax.lax.top_k(scores, sample_num)                     # (B, S)

    c_sel = jnp.take_along_axis(curr, idx_sel[:, :, None], axis=1)                 # (B,S,C)
    p_sel = jnp.take_along_axis(pos, idx_sel[:, None, :, None], axis=2)            # (B,P,S,C)
    # bf16 halves HBM->VMEM traffic; normalize/exp/log run in f32 inside the kernel.
    return c_sel.astype(jnp.bfloat16), p_sel.astype(jnp.bfloat16)


# Pure-JAX reference (same math as the torch forward on the selected samples).
def contrast2_ref(c_sel, p_sel, tau=TAU):
    c = c_sel.astype(jnp.float32)
    p = p_sel.astype(jnp.float32)
    cn = c / jnp.maximum(jnp.linalg.norm(c, axis=-1, keepdims=True), EPS_NORM)
    pn = p / jnp.maximum(jnp.linalg.norm(p, axis=-1, keepdims=True), EPS_NORM)
    pos = jnp.sum(pn * cn[:, None], axis=-1).sum(axis=1)               # (B, S)
    pos_exp = jnp.exp(pos / tau)
    mat = jnp.exp(jnp.einsum("bsc,btc->bst", cn, cn,
                             precision="highest") / tau)               # (B, S, S)
    neg = mat.sum(axis=1) - jnp.diagonal(mat, axis1=1, axis2=2)        # (B, S)
    per = -jnp.log(pos_exp / (pos_exp + neg + EPS_DEN))
    return per.mean(axis=-1).sum() / c.shape[0]


if __name__ == "__main__":
    key = jax.random.PRNGKey(0)
    B, C, H, W = 4, 64, 16, 16
    n_proj, idx, sample_num = 3, 0, 32

    k_proj, k_mask, k_samp = jax.random.split(key, 3)
    proj_keys = jax.random.split(k_proj, n_proj)
    proj_list = [jax.random.normal(proj_keys[i], (B, C, H, W), jnp.float32)
                 for i in range(n_proj)]
    # mask == 1: certain region; uncertain (fn_mask == 1) pixels are sampled
    mask = (jax.random.uniform(k_mask, (B, H, W)) < 0.5).astype(jnp.int32)
    pseudo_label = jnp.zeros((B, H, W), jnp.int32)  # unused by forward (kept for parity)

    c_sel, p_sel = select_hard_samples(proj_list, idx, mask, sample_num, k_samp)

    loss = contrast2_pallas(c_sel, p_sel)
    loss = jax.block_until_ready(loss)

    ref = contrast2_ref(c_sel, p_sel)
    assert jnp.allclose(loss, ref, rtol=2e-3, atol=2e-3), (float(loss), float(ref))

    print("KERNEL_OK")
</pallas_src>

<mosaic_0001>
module attributes {stable_mosaic.version = 11 : i64} {
  func.func @_contrast_kernel(%arg0: i32, %arg1: memref<2x32x128xbf16, #tpu.memory_space<vmem>>, %arg2: memref<2x2x32x128xbf16, #tpu.memory_space<vmem>>, %arg3: memref<1x2x1xf32, #tpu.memory_space<vmem>>) attributes {dimension_semantics = [#tpu.dimension_semantics<parallel>], iteration_bounds = array<i64: 2>, scalar_prefetch = 0 : i64, scratch_operands = 0 : i64, tpu.core_type = #tpu.core_type<tc>, window_params = [{transform_indices = @transform_0, window_bounds = array<i64: 2, 32, 128>}, {transform_indices = @transform_1, window_bounds = array<i64: 2, 2, 32, 128>}, {transform_indices = @transform_2, window_bounds = array<i64: 1, 2, 1>}]} {
    %c0 = arith.constant 0 : index
    %c0_0 = arith.constant 0 : index
    %c0_1 = arith.constant 0 : index
    %0 = vector.load %arg1[%c0, %c0_0, %c0_1] : memref<2x32x128xbf16, #tpu.memory_space<vmem>>, vector<2x32x128xbf16>
    %1 = arith.extf %0 : vector<2x32x128xbf16> to vector<2x32x128xf32>
    %2 = arith.mulf %1, %1 : vector<2x32x128xf32>
    %cst = arith.constant dense<0.000000e+00> : vector<2x32xf32>
    %3 = vector.multi_reduction <add>, %2, %cst [2] : vector<2x32x128xf32> to vector<2x32xf32>
    %4 = vector.shape_cast %3 : vector<2x32xf32> to vector<2x32x1xf32>
    %cst_2 = arith.constant 1.000000e-24 : f32
    %5 = vector.broadcast %cst_2 : f32 to vector<2x32x1xf32>
    %6 = arith.maximumf %4, %5 : vector<2x32x1xf32>
    %7 = math.rsqrt %6 : vector<2x32x1xf32>
    %8 = vector.broadcast %7 : vector<2x32x1xf32> to vector<2x32x128xf32>
    %9 = arith.mulf %1, %8 : vector<2x32x128xf32>
    %cst_3 = arith.constant 0.000000e+00 : f32
    %10 = vector.broadcast %cst_3 : f32 to vector<2x32x128xf32>
    %c0_4 = arith.constant 0 : index
    %c0_5 = arith.constant 0 : index
    %c0_6 = arith.constant 0 : index
    %c0_7 = arith.constant 0 : index
    %11 = vector.load %arg2[%c0_4, %c0_5, %c0_6, %c0_7] : memref<2x2x32x128xbf16, #tpu.memory_space<vmem>>, vector<2x1x32x128xbf16>
    %12 = vector.shape_cast %11 : vector<2x1x32x128xbf16> to vector<2x32x128xbf16>
    %13 = arith.extf %12 : vector<2x32x128xbf16> to vector<2x32x128xf32>
    %14 = arith.mulf %13, %13 : vector<2x32x128xf32>
    %cst_8 = arith.constant dense<0.000000e+00> : vector<2x32xf32>
    %15 = vector.multi_reduction <add>, %14, %cst_8 [2] : vector<2x32x128xf32> to vector<2x32xf32>
    %16 = vector.shape_cast %15 : vector<2x32xf32> to vector<2x32x1xf32>
    %cst_9 = arith.constant 1.000000e-24 : f32
    %17 = vector.broadcast %cst_9 : f32 to vector<2x32x1xf32>
    %18 = arith.maximumf %16, %17 : vector<2x32x1xf32>
    %19 = math.rsqrt %18 : vector<2x32x1xf32>
    %20 = vector.broadcast %19 : vector<2x32x1xf32> to vector<2x32x128xf32>
    %21 = arith.mulf %13, %20 : vector<2x32x128xf32>
    %22 = arith.addf %10, %21 : vector<2x32x128xf32>
    %c0_10 = arith.constant 0 : index
    %c1 = arith.constant 1 : index
    %c0_11 = arith.constant 0 : index
    %c0_12 = arith.constant 0 : index
    %23 = vector.load %arg2[%c0_10, %c1, %c0_11, %c0_12] : memref<2x2x32x128xbf16, #tpu.memory_space<vmem>>, vector<2x1x32x128xbf16>
    %24 = vector.shape_cast %23 : vector<2x1x32x128xbf16> to vector<2x32x128xbf16>
    %25 = arith.extf %24 : vector<2x32x128xbf16> to vector<2x32x128xf32>
    %26 = arith.mulf %25, %25 : vector<2x32x128xf32>
    %cst_13 = arith.constant dense<0.000000e+00> : vector<2x32xf32>
    %27 = vector.multi_reduction <add>, %26, %cst_13 [2] : vector<2x32x128xf32> to vector<2x32xf32>
    %28 = vector.shape_cast %27 : vector<2x32xf32> to vector<2x32x1xf32>
    %cst_14 = arith.constant 1.000000e-24 : f32
    %29 = vector.broadcast %cst_14 : f32 to vector<2x32x1xf32>
    %30 = arith.maximumf %28, %29 : vector<2x32x1xf32>
    %31 = math.rsqrt %30 : vector<2x32x1xf32>
    %32 = vector.broadcast %31 : vector<2x32x1xf32> to vector<2x32x128xf32>
    %33 = arith.mulf %25, %32 : vector<2x32x128xf32>
    %34 = arith.addf %22, %33 : vector<2x32x128xf32>
    %35 = arith.mulf %9, %34 : vector<2x32x128xf32>
    %cst_15 = arith.constant dense<0.000000e+00> : vector<2x32xf32>
    %36 = vector.multi_reduction <add>, %35, %cst_15 [2] : vector<2x32x128xf32> to vector<2x32xf32>
    %cst_16 = arith.constant 14.2857141 : f32
    %37 = vector.broadcast %cst_16 : f32 to vector<2x32xf32>
    %38 = arith.mulf %36, %37 : vector<2x32xf32>
    %39 = arith.truncf %9 : vector<2x32x128xf32> to vector<2x32x128xbf16>
    %cst_17 = arith.constant 0.000000e+00 : f32
    %40 = vector.broadcast %cst_17 : f32 to vector<2x32xf32>
    "tpu.trace_start"() <{level = 10 : i32, message = "brc,btc->brt"}> : () -> ()
    %cst_18 = arith.constant dense<0.000000e+00> : vector<2x32x32xf32>
    %41 = tpu.matmul %39, %39, %cst_18 {dimension_numbers = #tpu.dot_dimension_numbers<[2], [2], [1], [1], [0, 0, 0, 1, 1, 1], [0], [0]>} : vector<2x32x128xbf16>, vector<2x32x128xbf16>, vector<2x32x32xf32> -> vector<2x32x32xf32>
    "tpu.trace_stop"() : () -> ()
    %42 = tpu.iota {dimensions = array<i32: 0>} : vector<32x32xi32>
    %c0_i32 = arith.constant 0 : i32
    %43 = vector.broadcast %c0_i32 : i32 to vector<32x32xi32>
    %44 = arith.addi %42, %43 : vector<32x32xi32>
    %45 = tpu.iota {dimensions = array<i32: 1>} : vector<32x32xi32>
    %46 = arith.cmpi ne, %44, %45 : vector<32x32xi32>
    %47 = vector.shape_cast %46 : vector<32x32xi1> to vector<1x32x32xi1>
    %cst_19 = arith.constant 14.2857141 : f32
    %48 = vector.broadcast %cst_19 : f32 to vector<2x32x32xf32>
    %49 = arith.mulf %41, %48 : vector<2x32x32xf32>
    %50 = math.exp %49 : vector<2x32x32xf32>
    %cst_20 = arith.constant 0.000000e+00 : f32
    %51 = vector.shape_cast %47 : vector<1x32x32xi1> to vector<1x32x32xi1>
    %52 = vector.broadcast %51 : vector<1x32x32xi1> to vector<2x32x32xi1>
    %53 = vector.broadcast %cst_20 : f32 to vector<2x32x32xf32>
    %54 = arith.select %52, %50, %53 : vector<2x32x32xi1>, vector<2x32x32xf32>
    %cst_21 = arith.constant dense<0.000000e+00> : vector<2x32xf32>
    %55 = vector.multi_reduction <add>, %54, %cst_21 [1] : vector<2x32x32xf32> to vector<2x32xf32>
    %56 = arith.addf %40, %55 : vector<2x32xf32>
    %cst_22 = arith.constant 9.99999993E-9 : f32
    %57 = vector.broadcast %cst_22 : f32 to vector<2x32xf32>
    %58 = arith.addf %56, %57 : vector<2x32xf32>
    %59 = math.log %58 : vector<2x32xf32>
    %60 = arith.maximumf %38, %59 : vector<2x32xf32>
    %61 = arith.subf %38, %59 : vector<2x32xf32>
    %62 = math.absf %61 : vector<2x32xf32>
    %cst_23 = arith.constant 0.000000e+00 : f32
    %63 = vector.broadcast %cst_23 : f32 to vector<2x32xf32>
    %64 = arith.subf %63, %62 : vector<2x32xf32>
    %65 = math.exp %64 : vector<2x32xf32>
    %cst_24 = arith.constant 1.000000e+00 : f32
    %66 = vector.broadcast %cst_24 : f32 to vector<2x32xf32>
    %67 = arith.addf %66, %65 : vector<2x32xf32>
    %68 = math.log %67 : vector<2x32xf32>
    %69 = arith.addf %60, %68 : vector<2x32xf32>
    %70 = arith.subf %69, %38 : vector<2x32xf32>
    %cst_25 = arith.constant dense<0.000000e+00> : vector<2xf32>
    %71 = vector.multi_reduction <add>, %70, %cst_25 [1] : vector<2x32xf32> to vector<2xf32>
    %72 = vector.shape_cast %71 : vector<2xf32> to vector<2x1xf32>
    %cst_26 = arith.constant 3.125000e-02 : f32
    %73 = vector.broadcast %cst_26 : f32 to vector<2x1xf32>
    %74 = arith.mulf %72, %73 : vector<2x1xf32>
    %75 = vector.shape_cast %74 : vector<2x1xf32> to vector<1x2x1xf32>
    %c0_27 = arith.constant 0 : index
    %c0_28 = arith.constant 0 : index
    %c0_29 = arith.constant 0 : index
    %76 = vector.load %arg3[%c0_27, %c0_28, %c0_29] : memref<1x2x1xf32, #tpu.memory_space<vmem>>, vector<1x2x1xf32>
    tpu.vector_store %arg3[%c0_27, %c0_28, %c0_29], %75 {strides = array<i32>} : memref<1x2x1xf32, #tpu.memory_space<vmem>>, vector<1x2x1xf32>,
    return
  }
  func.func @transform_0(%arg0: i32) -> (i32, i32, i32) {
    %c0_i32 = arith.constant 0 : i32
    %c0_i32_0 = arith.constant 0 : i32
    %c0_i32_1 = arith.constant 0 : i32
    return %arg0, %c0_i32, %c0_i32_0 : i32, i32, i32
  }
  func.func @transform_1(%arg0: i32) -> (i32, i32, i32, i32) {
    %c0_i32 = arith.constant 0 : i32
    %c0_i32_0 = arith.constant 0 : i32
    %c0_i32_1 = arith.constant 0 : i32
    %c0_i32_2 = arith.constant 0 : i32
    return %arg0, %c0_i32, %c0_i32_0, %c0_i32_1 : i32, i32, i32, i32
  }
  func.func @transform_2(%arg0: i32) -> (i32, i32, i32) {
    %c0_i32 = arith.constant 0 : i32
    %c0_i32_0 = arith.constant 0 : i32
    %c0_i32_1 = arith.constant 0 : i32
    return %arg0, %c0_i32, %c0_i32_0 : i32, i32, i32
  }
}

</mosaic_0001>

<bundles_post_ra>
// kernel: tpu_custom_call.1
= control target key start
LH: loop header
LB: loop body
LE: loop exit
PB: predicated region body
PF: predicated region fallthrough
CT: control target
= control target key end

     0   :  { %7 = vsyncpa [#allocation3], 0  ;;  %s1730_s0 = inlined_call_operand.hbm [shape: bf16[4,32,128], index: 0, kind: input, shape index: {}]   ;;  %s1731_s1 = inlined_call_operand.hbm [shape: bf16[4,2,32,128], index: 1, kind: input, shape index: {}]   ;;  %s1732_s2 = inlined_call_operand.vmem [shape: f32[2,2,1], index: 2, kind: output, shape index: {}]  }
   0x1   :  { %9 = vsyncpa [#allocation3 + $0x1], 0 }
   0x2   :  { %10 = vsyncpa [#allocation5], 0 }
   0x3   :  { %12 = vsyncpa [#allocation5 + $0x1], 0  ;;  %s1314_s9 = smov 0   ;;  %s1316_s10 = smov 0  }
   0x4   :  { %s1318_s11 = smov 0   ;;  %s1320_s12 = smov 0  }
   0x5 LB: > { %s1333_s13 = sadd.s32 4294967295, %s1292_s12   ;;  %s1336_s14 = sadd.s32 1, %s1292_s12   ;;  %s1292_s12 = sphi %s1320_s12, %s1742_s12   ;;  %s1288_s11 = sphi %s1318_s11, %s1741_s11   ;;  %s1284_s10 = sphi %s1316_s10, %s1740_s10   ;;  %s1280_s9 = sphi %s1314_s9, %s1739_s9  }
   0x6   : > { %s22_s15 = ssub.s32 %s1292_s12, %s1336_s14  ;;  %s25_s16 = sadd.s32 1, %s1288_s11 }
   0x7   : > { %p23_p0 = scmp.eq.s32.totalorder %s22_s15, 0  ;;  %p32_p1 = scmp.ne.s32.totalorder %s1288_s11, %s1284_s10 }
   0x8   : > { %p33_p2 = scmp.eq.s32.totalorder %s1292_s12, 0  ;;  %p38_p3 = scmp.ne.s32.totalorder %s1284_s10, %s1280_s9 }
   0x9   : > { %s1346_s17 = scalar_select %p23_p0, %s1288_s11, %s25_s16  }
   0xa   : > { %p34_p4 = por %p33_p2, %p32_p1  ;;  %p39_p5 = scmp.eq.s32.totalorder %s1333_s13, 0 }
   0xb   : > { %p1060_p6 = scmp.lt.s32.totalorder %s1292_s12, 2  ;;  %s1355_s19 = sand.u32 1, %s1288_s11  }
   0xc   : > { %p1350_p7 = por %p39_p5, %p38_p3  ;;  %s941_s20 = sshll.u32 %s1355_s19, 5 }
   0xd   : > { %s964_s21 = sshll.u32 %s1292_s12, 9  ;;  %s118_s25 = scalar_lea.vmem [#allocation2], %s941_s20 }
   0xe   : > { %s1734_s18 = scalar_select %p1350_p7, 1, 0 }
   0xf   : > { %s1362_s24 = scalar_lea.hbm %s1730_s0, %s964_s21  ;;  %s126_s26 = sshll.u32 %s118_s25, 4  ;;  %s1364_s26 = int_to_ptr.vmem [resolvable:$true] %s126_s26 }
  0x10   : > { %p1366_p8 = pnand %p1060_p6, %p34_p4  ;;  %s115_s28 = scalar_lea.sflag [#allocation3], %s1355_s19 }
  0x11   : > { %s1198_s29 = scalar_lea.hbm %s1362_s24, 512  ;;  %s1203_s4 = scalar_lea.hbm %s1730_s0, 1024 }
  0x12   : > { %p1199_p10 = scmp.ne.s32.totalorder %s1362_s24, %s1198_s29  ;;  %p1200_p11 = pneg %p1366_p8 }
  0x13   : > { %p1204_p0 = scmp.lt.s32.totalorder %s1362_s24, %s1730_s0  ;;  %p1205_p1 = scmp.lt.s32.totalorder %s1203_s4, %s1198_s29 }
  0x14   : > { %p1201_p12 = pnand %p1200_p11, %p1199_p10 }
  0x15   : > { %p1206_p2 = por %p1205_p1, %p1204_p0 }
  0x16   : > { %p1202_p13 = pneg %p1201_p12 }
  0x18   : > { %p1207_p3 = pnand %p1206_p2, %p1202_p13 }
  0x1a   : > { %1210 = shalt.err (!%p1207_p3)
}
  0x1b   : > { %s1211_s7 = scalar_lea.vmem %s1364_s26, 512  ;;  %s1294_s8 = smov [#allocation2]  }
  0x1c   : > { %p1212_p4 = scmp.ne.s32.totalorder %s1364_s26, %s1211_s7  ;;  %s1216_s9 = sshll.u32 %s1294_s8, 4  ;;  %s1217_s9 = int_to_ptr.vmem [resolvable:$false] %s1216_s9 }
  0x1d   : > { %s1218_s15 = scalar_lea.vmem %s1217_s9, 1024  ;;  %p1219_p10 = scmp.lt.s32.totalorder %s1364_s26, %s1217_s9 }
  0x1e   : > { %p1214_p5 = pnand %p1212_p4, %p1200_p11  ;;  %p1220_p12 = scmp.lt.s32.totalorder %s1218_s15, %s1211_s7 }
  0x20   : > { %p1215_p6 = pneg %p1214_p5  ;;  %p1221_p9 = por %p1220_p12, %p1219_p10 }
  0x22   : > { %p1222_p0 = pnand %p1221_p9, %p1215_p6 }
  0x24   : > { %1225 = shalt.err (!%p1222_p0)
}
  0x25   : > { %s1295_s16 = smov 64   ;;  %s1296_s20 = smov 4  }
  0x26   : > { %1056 = dma.hbm_to_vmem [thread:$0]  (!%p1366_p8), %s1362_s24, 512, %s1364_s26, %s115_s28, %s1295_s16, %s1295_s16, %s1296_s20  }
  0x27   : > { %p156_p9 = scmp.lt.s32.totalorder %s1292_s12, 3  ;;  %s945_s21 = sshll.u32 %s1355_s19, 6 }
  0x28   : > { %s966_s22 = sshll.u32 %s1292_s12, 10  ;;  %p1736_p13 = scmp.ge.s32.totalorder %s1292_s12, 1 }
  0x29   : > { %s1413_s30 = scalar_lea.hbm %s1731_s1, %s966_s22  ;;  %s140_s3 = scalar_lea.vmem [#allocation4], %s945_s21 }
  0x2a   : > { %p1406_p1 = pnand %p1736_p13, %p156_p9  ;;  %s148_s4 = sshll.u32 %s140_s3, 4  ;;  %s1415_s4 = int_to_ptr.vmem [resolvable:$true] %s148_s4 }
  0x2b   : > { %s137_s24 = scalar_lea.sflag [#allocation5], %s1355_s19  ;;  %s1226_s26 = scalar_lea.hbm %s1413_s30, 1024 }
  0x2c   : > { %p1227_p2 = scmp.ne.s32.totalorder %s1413_s30, %s1226_s26  ;;  %s1231_s5 = scalar_lea.hbm %s1731_s1, 2048 }
  0x2d   : > { %p1232_p5 = scmp.lt.s32.totalorder %s1413_s30, %s1731_s1  ;;  %p1233_p6 = scmp.lt.s32.totalorder %s1231_s5, %s1226_s26 }
  0x2e   : > { %p1229_p3 = pnand %p1227_p2, %p1200_p11 }
  0x2f   : > { %p1234_p10 = por %p1233_p6, %p1232_p5 }
  0x30   : > { %p1230_p4 = pneg %p1229_p3 }
  0x32   : > { %p1235_p12 = pnand %p1234_p10, %p1230_p4 }
  0x34   : > { %1238 = shalt.err (!%p1235_p12)
}
  0x35   : > { %s1239_s19 = scalar_lea.vmem %s1415_s4, 1024  ;;  %s1297_s8 = smov [#allocation4]  }
  0x36   : > { %p1240_p0 = scmp.ne.s32.totalorder %s1415_s4, %s1239_s19  ;;  %s1244_s9 = sshll.u32 %s1297_s8, 4  ;;  %s1245_s9 = int_to_ptr.vmem [resolvable:$false] %s1244_s9 }
  0x37   : > { %s1246_s15 = scalar_lea.vmem %s1245_s9, 2048  ;;  %p1247_p2 = scmp.lt.s32.totalorder %s1415_s4, %s1245_s9 }
  0x38   : > { %p1242_p9 = pnand %p1240_p0, %p1200_p11  ;;  %p1248_p3 = scmp.lt.s32.totalorder %s1246_s15, %s1239_s19 }
  0x3a   : > { %p1243_p13 = pneg %p1242_p9  ;;  %p1249_p7 = por %p1248_p3, %p1247_p2 }
  0x3c   : > { %p1250_p5 = pnand %p1249_p7, %p1243_p13 }
  0x3e   : > { %1253 = shalt.err (!%p1250_p5)
}
  0x3f   : > { %1059 = dma.hbm_to_vmem [thread:$0]  (!%p1366_p8), %s1413_s30, 1024, %s1415_s4, %s137_s24, %s1295_s16, %s1295_s16, %s1296_s20  }
  0x40   : > { %160 = sbr.rel (%p1406_p1) target bundleno = 959 (0x3bf), region = 28  ;;  %s162_s21 = sand.u32 (!%p1406_p1), 1, %s1284_s10  }
  0x41   : > { %s950_s22 = sshll.u32 (!%p1406_p1), %s162_s21, 5  ;;  %s163_s25 = scalar_lea.sflag (!%p1406_p1), [#allocation3], %s162_s21 }
  0x42   : > { %s166_s29 = scalar_lea.vmem (!%p1406_p1), [#allocation2], %s950_s22  ;;  %p1738_p11 = scmp.ne.s32.totalorder (!%p1406_p1), %s1734_s18, 0 }
  0x45   : > { %1271 = dma.done.wait (%p1738_p11), %s163_s25, 512  }
  0x46   : > { %1273 = vsyncadd (%p1738_p11), %s163_s25, 4294966784  ;;  %s951_s27 = sshll.u32 %s162_s21, 6  ;;  %s172_s3 = scalar_lea.sflag [#allocation5], %s162_s21 }
  0x47   : > { %s1450_s26 = scalar_lea.vmem [#allocation4], %s951_s27 }
  0x48   : > { %1275 = dma.done.wait (%p1738_p11), %s172_s3, 1024  }
  0x49   : > { %1277 = vsyncadd (%p1738_p11), %s172_s3, 4294966272  ;;  %v1017_v0 = vld [vmem:[%s166_s29 + $0x18] sm:$0xff]   ;;  %v1015_v1 = vld [vmem:[%s166_s29 + $0x8] sm:$0xff]   ;;  %vm601_vm4 = vcmask 261120   ;;  %vm805_vm5 = vcmask 130112   ;;  %vm812_vm6 = vcmask 195712  }
  0x4a   : > { %v1456_v2 = vunpack.c.l.bf16 %v1017_v0  ;;  %v1458_v3 = vunpack.c.l.bf16 %v1015_v1  ;;  %v1460_v4 = vunpack.c.h.bf16 %v1017_v0  ;;  %v1462_v5 = vunpack.c.h.bf16 %v1015_v1  ;;  %v968_v6 = vld [vmem:[%s166_s29] sm:$0xff]   ;;  %v1016_v13 = vld [vmem:[%s166_s29 + $0x10] sm:$0xff]   ;;  %v1020_v38 = vld [vmem:[%s1450_s26 + $0x28] sm:$0xff]   ;;  %p202_p7 = scmp.lt.s32.totalorder %s1333_s13, 1 }
  0x4b   : > { %v1472_v11 = vunpack.c.h.bf16 %v968_v6  ;;  %v1474_v12 = vunpack.c.l.bf16 %v968_v6  ;;  %v1480_v16 = vunpack.c.h.bf16 %v1016_v13  ;;  %v1482_v17 = vunpack.c.l.bf16 %v1016_v13  ;;  %v984_v18 = vld [vmem:[%s1450_s26] sm:$0xff]   ;;  %v1021_v28 = vld [vmem:[%s1450_s26 + $0x10] sm:$0xff]   ;;  %v1018_v39 = vld [vmem:[%s1450_s26 + $0x8] sm:$0xff]  }
  0x4c   : > { %v229_v7 = vmul.f32 %v1456_v2, %v1456_v2  ;;  %v225_v8 = vmul.f32 %v1458_v3, %v1458_v3  ;;  %v230_v9 = vmul.f32 %v1460_v4, %v1460_v4  ;;  %v226_v10 = vmul.f32 %v1462_v5, %v1462_v5  ;;  %v1019_v23 = vld [vmem:[%s1450_s26 + $0x20] sm:$0xff]   ;;  %v1023_v33 = vld [vmem:[%s1450_s26 + $0x30] sm:$0xff]   ;;  %v1024_v44 = vld [vmem:[%s1450_s26 + $0x38] sm:$0xff]   ;;  %s1744_s13 = smov (!%p202_p7, %s1333_s13), 1 }
  0x4d   : > { %v224_v14 = vmul.f32 %v1472_v11, %v1472_v11  ;;  %v223_v15 = vmul.f32 %v1474_v12, %v1474_v12  ;;  %v228_v19 = vmul.f32 %v1480_v16, %v1480_v16  ;;  %v227_v20 = vmul.f32 %v1482_v17, %v1482_v17  ;;  %v1022_v45 = vld [vmem:[%s1450_s26 + $0x18] sm:$0xff]   ;;  %s952_s18 = sshll.u32 %s1744_s13, 1 }
  0x4e   : > { %243 = vadd.xlane.f32.xlu1 %v229_v7  ;;  %235 = vadd.xlane.f32.xlu0 %v225_v8  ;;  %v1489_v21 = vunpack.c.h.bf16 %v984_v18  ;;  %v1491_v22 = vunpack.c.l.bf16 %v984_v18  ;;  %v1498_v26 = vunpack.c.h.bf16 %v1019_v23  ;;  %v1500_v27 = vunpack.c.l.bf16 %v1019_v23  ;;  %s205_s23 = scalar_lea.vmem %s1732_s2, %s952_s18 }
  0x4f   : > { %v1507_v31 = vunpack.c.h.bf16 %v1021_v28  ;;  %v1509_v32 = vunpack.c.l.bf16 %v1021_v28  ;;  %v1516_v36 = vunpack.c.h.bf16 %v1023_v33  ;;  %v1518_v37 = vunpack.c.l.bf16 %v1023_v33 }
  0x50   : > { %v288_v24 = vmul.f32 %v1489_v21, %v1489_v21  ;;  %v287_v25 = vmul.f32 %v1491_v22, %v1491_v22  ;;  %v292_v29 = vmul.f32 %v1498_v26, %v1498_v26  ;;  %v291_v30 = vmul.f32 %v1500_v27, %v1500_v27 }
  0x51   : > { %v361_v34 = vmul.f32 %v1507_v31, %v1507_v31  ;;  %v360_v35 = vmul.f32 %v1509_v32, %v1509_v32  ;;  %v365_v40 = vmul.f32 %v1516_v36, %v1516_v36  ;;  %v364_v41 = vmul.f32 %v1518_v37, %v1518_v37 }
  0x52   : > { %245 = vadd.xlane.f32.xlu1 %v230_v9  ;;  %237 = vadd.xlane.f32.xlu0 %v226_v10  ;;  %v1526_v42 = vunpack.c.l.bf16 %v1020_v38  ;;  %v1528_v43 = vunpack.c.l.bf16 %v1018_v39  ;;  %v1536_v48 = vunpack.c.l.bf16 %v1024_v44  ;;  %v1538_v49 = vunpack.c.l.bf16 %v1022_v45 }
  0x53   : > { %v1544_v52 = vunpack.c.h.bf16 %v1020_v38  ;;  %v1546_v53 = vunpack.c.h.bf16 %v1018_v39  ;;  %v1552_v56 = vunpack.c.h.bf16 %v1024_v44  ;;  %v1554_v57 = vunpack.c.h.bf16 %v1022_v45 }
  0x54   : > { %v293_v46 = vmul.f32 %v1526_v42, %v1526_v42  ;;  %v289_v47 = vmul.f32 %v1528_v43, %v1528_v43  ;;  %v366_v50 = vmul.f32 %v1536_v48, %v1536_v48  ;;  %v362_v51 = vmul.f32 %v1538_v49, %v1538_v49 }
  0x55   : > { %v294_v54 = vmul.f32 %v1544_v52, %v1544_v52  ;;  %v290_v55 = vmul.f32 %v1546_v53, %v1546_v53  ;;  %v367_v58 = vmul.f32 %v1552_v56, %v1552_v56  ;;  %v363_v59 = vmul.f32 %v1554_v57, %v1554_v57 }
  0x56   : > { %233 = vadd.xlane.f32.xlu1 %v224_v14  ;;  %231 = vadd.xlane.f32.xlu0 %v223_v15  ;;  %vm819_vm7 = vcmask 261312   ;;  %vm840_vm8 = vcmask 1041409   ;;  %vm843_vm9 = vcmask 254976   ;;  %vm848_vm10 = vcmask 1024  }
  0x5a   : > { %241 = vadd.xlane.f32.xlu1 %v228_v19  ;;  %239 = vadd.xlane.f32.xlu0 %v227_v20 }
  0x5e   : > { %297 = vadd.xlane.f32.xlu1 %v288_v24  ;;  %295 = vadd.xlane.f32.xlu0 %v287_v25 }
  0x62   : > { %305 = vadd.xlane.f32.xlu1 %v292_v29  ;;  %303 = vadd.xlane.f32.xlu0 %v291_v30 }
  0x66   : > { %370 = vadd.xlane.f32.xlu1 %v361_v34  ;;  %368 = vadd.xlane.f32.xlu0 %v360_v35 }
  0x6a   : > { %378 = vadd.xlane.f32.xlu1 %v365_v40  ;;  %376 = vadd.xlane.f32.xlu0 %v364_v41 }
  0x6e   : > { %307 = vadd.xlane.f32.xlu1 %v293_v46  ;;  %299 = vadd.xlane.f32.xlu0 %v289_v47 }
  0x72   : > { %380 = vadd.xlane.f32.xlu1 %v366_v50  ;;  %372 = vadd.xlane.f32.xlu0 %v362_v51 }
  0x76   : > { %309 = vadd.xlane.f32.xlu1 %v294_v54  ;;  %301 = vadd.xlane.f32.xlu0 %v290_v55 }
  0x7a   : > { %382 = vadd.xlane.f32.xlu1 %v367_v58  ;;  %374 = vadd.xlane.f32.xlu0 %v363_v59 }
  0xd7   : > { %v244_v60 = vpop.xlane.xlu1 %243  ;;  %v236_v61 = vpop.xlane.xlu0 %235 }
  0xd8   : > { %v253_v62 = vmax.f32 %v244_v60, 1e-24  ;;  %v249_v63 = vmax.f32 %v236_v61, 1e-24 }
  0xda   : > { %1098 = vrsqrt.f32 %v253_v62 }
  0xdb   : > { %v246_v0 = vpop.xlane.xlu1 %245  ;;  %v238_v1 = vpop.xlane.xlu0 %237  ;;  %1100 = vrsqrt.f32 %v249_v63 }
  0xdc   : > { %v254_v6 = vmax.f32 %v246_v0, 1e-24  ;;  %v250_v7 = vmax.f32 %v238_v1, 1e-24 }
  0xde   : > { %1102 = vrsqrt.f32 %v254_v6 }
  0xdf   : > { %1104 = vrsqrt.f32 %v250_v7  ;;  %v234_v8 = vpop.xlane.xlu1 %233  ;;  %v232_v9 = vpop.xlane.xlu0 %231 }
  0xe0   : > { %v248_v10 = vmax.f32 %v234_v8, 1e-24  ;;  %v247_v13 = vmax.f32 %v232_v9, 1e-24 }
  0xe2   : > { %1106 = vrsqrt.f32 %v248_v10 }
  0xe3   : > { %1108 = vrsqrt.f32 %v247_v13  ;;  %v242_v14 = vpop.xlane.xlu1 %241  ;;  %v240_v15 = vpop.xlane.xlu0 %239 }
  0xe4   : > { %v252_v18 = vmax.f32 %v242_v14, 1e-24  ;;  %v251_v19 = vmax.f32 %v240_v15, 1e-24 }
  0xe6   : > { %1110 = vrsqrt.f32 %v252_v18 }
  0xe7   : > { %v1099_v20 = vpop.eup %1098  ;;  %1112 = vrsqrt.f32 %v251_v19  ;;  %v298_v23 = vpop.xlane.xlu1 %297 }
  0xe8   : > { %v296_v24 = vpop.xlane.xlu0 %295  ;;  %v1101_v25 = vpop.eup %1100  ;;  %v312_v28 = vmax.f32 %v298_v23, 1e-24  ;;  %v1561_v29 = vmul.f32 %v1099_v20, %v1456_v2 }
  0xe9   : > { %v311_v33 = vmax.f32 %v296_v24, 1e-24  ;;  %v1567_v44 = vmul.f32 %v1101_v25, %v1458_v3 }
  0xea   : > { %1114 = vrsqrt.f32 %v312_v28 }
  0xeb   : > { %v1103_v30 = vpop.eup %1102  ;;  %v306_v34 = vpop.xlane.xlu1 %305  ;;  %1116 = vrsqrt.f32 %v311_v33 }
  0xec   : > { %v304_v35 = vpop.xlane.xlu0 %303  ;;  %v1105_v38 = vpop.eup %1104  ;;  %v316_v39 = vmax.f32 %v306_v34, 1e-24  ;;  %v1564_v40 = vmul.f32 %v1103_v30, %v1460_v4 }
  0xed   : > { %v315_v41 = vmax.f32 %v304_v35, 1e-24  ;;  %v1570_v45 = vmul.f32 %v1105_v38, %v1462_v5 }
  0xee   : > { %v451_v2 = vpack.c.bf16 %v1564_v40, %v1561_v29  ;;  %1118 = vrsqrt.f32 %v316_v39 }
  0xef   : > { %v1107_v46 = vpop.eup %1106  ;;  %v371_v47 = vpop.xlane.xlu1 %370  ;;  %v449_v51 = vpack.c.bf16 %v1570_v45, %v1567_v44  ;;  %1120 = vrsqrt.f32 %v315_v41 }
  0xf0   : > { %v369_v50 = vpop.xlane.xlu0 %368  ;;  %v1109_v4 = vpop.eup %1108  ;;  %v385_v54 = vmax.f32 %v371_v47, 1e-24  ;;  %1041 = vmatprep.subr.bf16.mxu1 %v451_v2  ;;  %v1577_v3 = vmul.f32 %v1107_v46, %v1472_v11 }
  0xf1   : > { %v384_v55 = vmax.f32 %v369_v50, 1e-24  ;;  %1033 = vmatprep.subr.bf16.mxu0 %v449_v51  ;;  %1042 = vmatpush3.bf16.xpose.msra.mxu1 %v451_v2  ;;  %v1580_v5 = vmul.f32 %v1109_v4, %v1474_v12 }
  0xf2   : > { %1122 = vrsqrt.f32 %v385_v54  ;;  %1034 = vmatpush3.bf16.xpose.msra.mxu0 %v449_v51 }
  0xf3   : > { %v1111_v58 = vpop.eup %1110  ;;  %1124 = vrsqrt.f32 %v384_v55  ;;  %v379_v59 = vpop.xlane.xlu1 %378  ;;  %v448_v61 = vpack.c.bf16 %v1577_v3, %v1580_v5 }
  0xf4   : > { %v377_v60 = vpop.xlane.xlu0 %376  ;;  %v1113_v62 = vpop.eup %1112  ;;  %v389_v63 = vmax.f32 %v379_v59, 1e-24  ;;  %v1585_v11 = vmul.f32 %v1111_v58, %v1480_v16 }
  0xf5   : > { %v388_v0 = vmax.f32 %v377_v60, 1e-24  ;;  %1035 = vmatprep.subr.bf16.mxu0 %v448_v61  ;;  %1037 = vmatprep.mubr.bf16.mxu0 %v448_v61  ;;  %v267_v12 = vmul.f32 %v1113_v62, %v1482_v17 }
  0xf6   : > { %1126 = vrsqrt.f32 %v389_v63 }
  0xf7   : > { %1128 = vrsqrt.f32 %v388_v0  ;;  %v308_v1 = vpop.xlane.xlu1 %307  ;;  %v450_v7 = vpack.c.bf16 %v1585_v11, %v267_v12  ;;  %v1115_v10 = vpop.eup %1114 }
  0xf8   : > { %v300_v6 = vpop.xlane.xlu0 %299  ;;  %v317_v8 = vmax.f32 %v308_v1, 1e-24  ;;  %v1117_v14 = vpop.eup %1116  ;;  %v328_v20 = vmul.f32 %v1115_v10, %v1489_v21 }
  0xf9   : > { %v313_v9 = vmax.f32 %v300_v6, 1e-24  ;;  %1043 = vmatprep.subr.bf16.mxu1 %v450_v7  ;;  %1045 = vmatprep.mubr.bf16.mxu1 %v450_v7  ;;  %v327_v28 = vmul.f32 %v1117_v14, %v1491_v22 }
  0xfa   : > { %1130 = vrsqrt.f32 %v317_v8  ;;  %1036 = vmatpush3.bf16.xpose.msra.mxu0 %v448_v61  ;;  %1044 = vmatpush3.bf16.xpose.msra.mxu1 %v450_v7 }
  0xfb   : > { %1132 = vrsqrt.f32 %v313_v9  ;;  %v381_v16 = vpop.xlane.xlu1 %380  ;;  %v1119_v18 = vpop.eup %1118 }
  0xfc   : > { %v373_v13 = vpop.xlane.xlu0 %372  ;;  %v390_v15 = vmax.f32 %v381_v16, 1e-24  ;;  %v1121_v19 = vpop.eup %1120  ;;  %v332_v41 = vmul.f32 %v1119_v18, %v1498_v26 }
  0xfd   : > { %v386_v17 = vmax.f32 %v373_v13, 1e-24  ;;  %v331_v22 = vmul.f32 %v1121_v19, %v1500_v27 }
  0xfe   : > { %1134 = vrsqrt.f32 %v390_v15 }
  0xff   : > { %v1123_v23 = vpop.eup %1122  ;;  %1136 = vrsqrt.f32 %v386_v17  ;;  %v310_v24 = vpop.xlane.xlu1 %309 }
 0x100   : > { %v302_v25 = vpop.xlane.xlu0 %301  ;;  %v1125_v30 = vpop.eup %1124  ;;  %v318_v33 = vmax.f32 %v310_v24, 1e-24  ;;  %v401_v35 = vmul.f32 %v1123_v23, %v1507_v31 }
 0x101   : > { %v314_v34 = vmax.f32 %v302_v25, 1e-24  ;;  %1038 = vmatmul.mubr.bf16.vlgmr.msra.gmra.mxu0 %v449_v51  ;;  %1046 = vmatmul.mubr.bf16.vlgmr.msra.gmra.mxu1 %v451_v2  ;;  %v400_v38 = vmul.f32 %v1125_v30, %v1509_v32 }
 0x102   : > { %1138 = vrsqrt.f32 %v318_v33  ;;  %v409_v39 = vadd.f32 %v401_v35, %v328_v20 }
 0x103   : > { %v1127_v21 = vpop.eup %1126  ;;  %1140 = vrsqrt.f32 %v314_v34  ;;  %v383_v46 = vpop.xlane.xlu1 %382  ;;  %v408_v50 = vadd.f32 %v400_v38, %v327_v28 }
 0x104   : > { %v375_v47 = vpop.xlane.xlu0 %374  ;;  %v1129_v4 = vpop.eup %1128  ;;  %v391_v54 = vmax.f32 %v383_v46, 1e-24  ;;  %v417_v31 = vmul.f32 %v409_v39, %v1577_v3  ;;  %v405_v2 = vmul.f32 %v1127_v21, %v1516_v36 }
 0x105   : > { %v387_v55 = vmax.f32 %v375_v47, 1e-24  ;;  %v416_v32 = vmul.f32 %v408_v50, %v1580_v5  ;;  %v404_v51 = vmul.f32 %v1129_v4, %v1518_v37 }
 0x106   : > { %1142 = vrsqrt.f32 %v391_v54  ;;  %426 = vadd.xlane.f32.xlu1 %v417_v31  ;;  %v413_v26 = vadd.f32 %v405_v2, %v332_v41  ;;  %v550_v41 = vlaneseq }
 0x107   : > { %v1131_v58 = vpop.eup %1130  ;;  %1144 = vrsqrt.f32 %v387_v55  ;;  %424 = vadd.xlane.f32.xlu0 %v416_v32  ;;  %v412_v59 = vadd.f32 %v404_v51, %v331_v22 }
 0x108   : > { %v1133_v60 = vpop.eup %1132  ;;  %v421_v27 = vmul.f32 %v413_v26, %v1585_v11  ;;  %v333_v3 = vmul.f32 %v1131_v58, %v1526_v42  ;;  %v1612_v46 = vshrl.u32 %v550_v41, 7  ;;  %v1615_v22 = vand.u32 127, %v550_v41 }
 0x109   : > { %v420_v61 = vmul.f32 %v412_v59, %v267_v12  ;;  %v329_v36 = vmul.f32 %v1133_v60, %v1528_v43 }
 0x10a   : > { %434 = vadd.xlane.f32.xlu1 %v421_v27  ;;  %v553_v50 = vadd.s32 16, %v1612_v46  ;;  %v552_v4 = vadd.s32 8, %v1612_v46  ;;  %vm557_vm0 = vcmp.ne.s32.totalorder %v1612_v46, %v1615_v22  ;;  %v554_v31 = vadd.s32 24, %v1612_v46 }
 0x10b   : > { %v1135_v62 = vpop.eup %1134  ;;  %432 = vadd.xlane.f32.xlu0 %v420_v61 }
 0x10c   : > { %v1137_v5 = vpop.eup %1136  ;;  %v406_v37 = vmul.f32 %v1135_v62, %v1536_v48  ;;  %vm559_vm1 = vcmp.ne.s32.totalorder %v553_v50, %v1615_v22  ;;  %vm558_vm2 = vcmp.ne.s32.totalorder %v552_v4, %v1615_v22  ;;  %vm560_vm3 = vcmp.ne.s32.totalorder %v554_v31, %v1615_v22 }
 0x10d   : > { %v402_v63 = vmul.f32 %v1137_v5, %v1538_v49 }
 0x10e   : > { %v414_v0 = vadd.f32 %v406_v37, %v333_v3 }
 0x10f   : > { %v1139_v1 = vpop.eup %1138  ;;  %v410_v6 = vadd.f32 %v402_v63, %v329_v36 }
 0x110   : > { %v1141_v7 = vpop.eup %1140  ;;  %v422_v8 = vmul.f32 %v414_v0, %v1561_v29  ;;  %v334_v42 = vmul.f32 %v1139_v1, %v1544_v52 }
 0x111   : > { %v418_v11 = vmul.f32 %v410_v6, %v1567_v44  ;;  %v330_v43 = vmul.f32 %v1141_v7, %v1546_v53 }
 0x112   : > { %436 = vadd.xlane.f32.xlu1 %v422_v8 }
 0x113   : > { %v1143_v12 = vpop.eup %1142  ;;  %428 = vadd.xlane.f32.xlu0 %v418_v11 }
 0x114   : > { %v1145_v9 = vpop.eup %1144  ;;  %v407_v48 = vmul.f32 %v1143_v12, %v1552_v56 }
 0x115   : > { %v403_v49 = vmul.f32 %v1145_v9, %v1554_v57 }
 0x116   : > { %v415_v10 = vadd.f32 %v407_v48, %v334_v42 }
 0x117   : > { %v411_v16 = vadd.f32 %v403_v49, %v330_v43 }
 0x118   : > { %v423_v13 = vmul.f32 %v415_v10, %v1564_v40 }
 0x119   : > { %v419_v29 = vmul.f32 %v411_v16, %v1570_v45 }
 0x11a   : > { %438 = vadd.xlane.f32.xlu1 %v423_v13 }
 0x11b   : > { %430 = vadd.xlane.f32.xlu0 %v419_v29 }
 0x1c1   : > { %v1039_v44 = vpop.f32.mrf.mxu0  ;;  %v1047_v14 = vpop.f32.mrf.mxu1 }
 0x1c2   : > { %v563_v52 = vmul.f32 14.285714, %v1039_v44  ;;  %v567_v15 = vmul.f32 14.285714, %v1047_v14 }
 0x1c3   : > { %v486_v17 = vpop.f32.mrf.mxu0  ;;  %v535_v18 = vpop.f32.mrf.mxu1 }
 0x1c4   : > { %v573_v53 = vmul.f32 1.442695, %v563_v52  ;;  %v581_v19 = vmul.f32 1.442695, %v567_v15  ;;  %v561_v20 = vmul.f32 14.285714, %v486_v17 }
 0x1c5   : > { %v565_v56 = vmul.f32 14.285714, %v535_v18  ;;  %v1040_v23 = vpop.f32.mrf.mxu0  ;;  %v1048_v57 = vpop.f32.mrf.mxu1 }
 0x1c6   : > { %1146 = vpow2.f32 %v573_v53  ;;  %v569_v24 = vmul.f32 1.442695, %v561_v20  ;;  %v564_v25 = vmul.f32 14.285714, %v1040_v23  ;;  %v568_v40 = vmul.f32 14.285714, %v1048_v57 }
 0x1c7   : > { %1148 = vpow2.f32 %v581_v19  ;;  %v577_v45 = vmul.f32 1.442695, %v565_v56  ;;  %v489_v28 = vpop.f32.mrf.mxu0  ;;  %v538_v30 = vpop.f32.mrf.mxu1 }
 0x1c8   : > { %1150 = vpow2.f32 %v569_v24  ;;  %v575_v33 = vmul.f32 1.442695, %v564_v25  ;;  %v583_v34 = vmul.f32 1.442695, %v568_v40  ;;  %v562_v35 = vmul.f32 14.285714, %v489_v28  ;;  %v425_v28 = vpop.xlane.xlu0 %424 }
 0x1c9   : > { %1152 = vpow2.f32 %v577_v45  ;;  %v566_v38 = vmul.f32 14.285714, %v538_v30  ;;  %v1298_v40 = vmov 0   ;;  %v427_v45 = vpop.xlane.xlu1 %426 }
 0x1ca   : > { %1154 = vpow2.f32 %v575_v33  ;;  %v571_v39 = vmul.f32 1.442695, %v562_v35  ;;  %1097 = vset.pattern.permute.xlu1 %v1298_v40  ;;  %1096 = vset.pattern.permute.xlu0 %v1298_v40  ;;  %v1632_v41 = vmul.f32 14.285714, %v427_v45 }
 0x1cb   : > { %1156 = vpow2.f32 %v583_v34  ;;  %v579_v21 = vmul.f32 1.442695, %v566_v38 }
 0x1cc   : > { %1158 = vpow2.f32 %v571_v39  ;;  %v433_v33 = vpop.xlane.xlu0 %432 }
 0x1cd   : > { %1160 = vpow2.f32 %v579_v21  ;;  %v435_v30 = vpop.xlane.xlu1 %434  ;;  %v1634_v21 = vmul.f32 14.285714, %v425_v28 }
 0x1d0   : > { %v429_v35 = vpop.xlane.xlu0 %428 }
 0x1d1   : > { %v437_v34 = vpop.xlane.xlu1 %436 }
 0x1d3   : > { %v1147_v47 = vpop.eup %1146 }
 0x1d4   : > { %v1149_v54 = vpop.eup %1148  ;;  %v595_v27 = vsel %vm559_vm1, %v1147_v47, 0.0  ;;  %v431_v39 = vpop.xlane.xlu0 %430 }
 0x1d5   : > { %v1151_v55 = vpop.eup %1150  ;;  %v599_v3 = vsel %vm559_vm1, %v1149_v54, 0.0  ;;  %v605_v6 = vsel %vm601_vm4, %v595_v27, 0.0  ;;  %v439_v38 = vpop.xlane.xlu1 %438  ;;  %v1654_v27 = vmul.f32 14.285714, %v435_v30 }
 0x1d6   : > { %v1153_v2 = vpop.eup %1152  ;;  %v593_v26 = vsel %vm557_vm0, %v1151_v55, 0.0  ;;  %v618_v11 = vsel %vm601_vm4, %v599_v3, 0.0  ;;  %v1644_v55 = vmul.f32 14.285714, %v433_v33 }
 0x1d7   : > { %v1155_v32 = vpop.eup %1154  ;;  %v597_v59 = vsel %vm557_vm0, %v1153_v2, 0.0  ;;  %v602_v62 = vsel %vm601_vm4, %v593_v26, 0.0 }
 0x1d8   : > { %v1157_v51 = vpop.eup %1156  ;;  %v615_v37 = vsel %vm601_vm4, %v597_v59, 0.0  ;;  %v596_v63 = vsel %vm560_vm3, %v1155_v32, 0.0  ;;  %v1646_v32 = vmul.f32 14.285714, %v429_v35 }
 0x1d9   : > { %v1159_v58 = vpop.eup %1158  ;;  %v600_v7 = vsel %vm560_vm3, %v1157_v51, 0.0  ;;  %v607_v12 = vsel %vm601_vm4, %v596_v63, 0.0 }
 0x1da   : > { %v1161_v60 = vpop.eup %1160  ;;  %v594_v61 = vsel %vm558_vm2, %v1159_v58, 0.0  ;;  %v620_v9 = vsel %vm601_vm4, %v600_v7, 0.0 }
 0x1db   : > { %v603_v36 = vsel %vm601_vm4, %v594_v61, 0.0  ;;  %v598_v5 = vsel %vm558_vm2, %v1161_v60, 0.0 }
 0x1dc   : > { %v604_v0 = vadd.f32 %v603_v36, %v602_v62  ;;  %v616_v1 = vsel %vm601_vm4, %v598_v5, 0.0  ;;  %v1658_v5 = vmul.f32 14.285714, %v431_v39 }
 0x1dd   : > { %v617_v8 = vadd.f32 %v616_v1, %v615_v37 }
 0x1de   : > { %v606_v42 = vadd.f32 %v605_v6, %v604_v0 }
 0x1df   : > { %v619_v43 = vadd.f32 %v618_v11, %v617_v8  ;;  %v1668_v11 = vmul.f32 14.285714, %v437_v34 }
 0x1e0   : > { %v608_v48 = vadd.f32 %v607_v12, %v606_v42 }
 0x1e1   : > { %v621_v49 = vadd.f32 %v620_v9, %v619_v43 }
 0x1e2   : > { %v609_v10 = vrot.slane %v608_v48, 4 }
 0x1e3   : > { %v622_v16 = vrot.slane %v621_v49, 4 }
 0x1e4   : > { %v610_v13 = vadd.f32 %v609_v10, %v608_v48 }
 0x1e5   : > { %v623_v29 = vadd.f32 %v622_v16, %v621_v49 }
 0x1e6   : > { %v611_v44 = vrot.slane %v610_v13, 2 }
 0x1e7   : > { %v624_v14 = vrot.slane %v623_v29, 2 }
 0x1e8   : > { %v612_v52 = vadd.f32 %v611_v44, %v610_v13  ;;  %v1674_v13 = vmul.f32 14.285714, %v439_v38 }
 0x1e9   : > { %v625_v15 = vadd.f32 %v624_v14, %v623_v29 }
 0x1ea   : > { %v613_v17 = vrot.slane %v612_v52, 1 }
 0x1eb   : > { %v626_v18 = vrot.slane %v625_v15, 1 }
 0x1ec   : > { %v614_v53 = vadd.f32 %v613_v17, %v612_v52 }
 0x1ed   : > { %v627_v19 = vadd.f32 %v626_v18, %v625_v15 }
 0x1ee   : > { %v630_v20 = vadd.f32 1e-08, %v614_v53 }
 0x1ef   : > { %v631_v56 = vadd.f32 1e-08, %v627_v19 }
 0x1f0   : > { %1162 = vlog2.f32 %v630_v20 }
 0x1f1   : > { %1164 = vlog2.f32 %v631_v56 }
 0x1fd   : > { %v1163_v23 = vpop.eup %1162 }
 0x1fe   : > { %v633_v57 = vmul.f32 0.6931472, %v1163_v23  ;;  %v1165_v24 = vpop.eup %1164 }
 0x1ff   : > { %v635_v25 = vmul.f32 0.6931472, %v1165_v24 }
 0x200   : > { %643 = vbcast.lane.b32.xlu1 %v633_v57, 264  ;;  %639 = vbcast.lane.b32.xlu0 %v633_v57, 256 }
 0x204   : > { %654 = vbcast.lane.b32.xlu1 %v635_v25, 256  ;;  %647 = vbcast.lane.b32.xlu0 %v633_v57, 272 }
 0x208   : > { %658 = vbcast.lane.b32.xlu1 %v635_v25, 264  ;;  %651 = vbcast.lane.b32.xlu0 %v633_v57, 280 }
 0x20c   : > { %662 = vbcast.lane.b32.xlu1 %v635_v25, 272 }
 0x210   : > { %666 = vbcast.lane.b32.xlu1 %v635_v25, 280 }
 0x272   : > { %v1636_v47 = vpop.permute.xlu1 %643  ;;  %v1638_v50 = vpop.permute.xlu0 %639 }
 0x273   : > { %v685_v4 = vsub.f32 %v1632_v41, %v1636_v47  ;;  %v684_v54 = vsub.f32 %v1634_v21, %v1638_v50 }
 0x275   : > { %v693_v31 = vand.u32 2147483647, %v685_v4  ;;  %v692_v2 = vand.u32 2147483647, %v684_v54 }
 0x276   : > { %v1648_v51 = vpop.permute.xlu1 %654  ;;  %v1650_v26 = vpop.permute.xlu0 %647 }
 0x277   : > { %v701_v58 = vsub.f32 0.0, %v693_v31  ;;  %v700_v59 = vsub.f32 0.0, %v692_v2  ;;  %v688_v60 = vsub.f32 %v1644_v55, %v1648_v51  ;;  %v686_v61 = vsub.f32 %v1646_v32, %v1650_v26 }
 0x278   : > { %v677_v31 = vmax.f32 %v1632_v41, %v1636_v47 }
 0x279   : > { %v710_v3 = vmul.f32 1.442695, %v701_v58  ;;  %v708_v62 = vmul.f32 1.442695, %v700_v59  ;;  %v696_v36 = vand.u32 2147483647, %v688_v60  ;;  %v676_v59 = vmax.f32 %v1634_v21, %v1638_v50 }
 0x27a   : > { %v694_v37 = vand.u32 2147483647, %v686_v61  ;;  %v1660_v63 = vpop.permute.xlu1 %658  ;;  %v1662_v0 = vpop.permute.xlu0 %651  ;;  %v678_v50 = vmax.f32 %v1646_v32, %v1650_v26 }
 0x27b   : > { %1166 = vpow2.f32 %v710_v3  ;;  %v704_v1 = vsub.f32 0.0, %v696_v36  ;;  %v689_v6 = vsub.f32 %v1654_v27, %v1660_v63  ;;  %v687_v8 = vsub.f32 %v1658_v5, %v1662_v0 }
 0x27c   : > { %1168 = vpow2.f32 %v708_v62  ;;  %v702_v7 = vsub.f32 0.0, %v694_v37 }
 0x27d   : > { %v716_v42 = vmul.f32 1.442695, %v704_v1  ;;  %v697_v12 = vand.u32 2147483647, %v689_v6  ;;  %v695_v9 = vand.u32 2147483647, %v687_v8  ;;  %v680_v1 = vmax.f32 %v1644_v55, %v1648_v51 }
 0x27e   : > { %v712_v43 = vmul.f32 1.442695, %v702_v7  ;;  %v1670_v48 = vpop.permute.xlu1 %662 }
 0x27f   : > { %1170 = vpow2.f32 %v716_v42  ;;  %v705_v49 = vsub.f32 0.0, %v697_v12  ;;  %v690_v10 = vsub.f32 %v1668_v11, %v1670_v48  ;;  %v703_v16 = vsub.f32 0.0, %v695_v9 }
 0x280   : > { %1172 = vpow2.f32 %v712_v43  ;;  %v682_v26 = vmax.f32 %v1668_v11, %v1670_v48 }
 0x281   : > { %v718_v29 = vmul.f32 1.442695, %v705_v49  ;;  %v698_v44 = vand.u32 2147483647, %v690_v10  ;;  %v714_v14 = vmul.f32 1.442695, %v703_v16  ;;  %v681_v49 = vmax.f32 %v1654_v27, %v1660_v63 }
 0x282   : > { %v1676_v52 = vpop.permute.xlu1 %666 }
 0x283   : > { %1174 = vpow2.f32 %v718_v29  ;;  %v706_v15 = vsub.f32 0.0, %v698_v44  ;;  %v691_v17 = vsub.f32 %v1674_v13, %v1676_v52 }
 0x284   : > { %1176 = vpow2.f32 %v714_v14 }
 0x285   : > { %v720_v18 = vmul.f32 1.442695, %v706_v15  ;;  %v699_v53 = vand.u32 2147483647, %v691_v17 }
 0x287   : > { %1178 = vpow2.f32 %v720_v18  ;;  %v707_v19 = vsub.f32 0.0, %v699_v53 }
 0x288   : > { %v1167_v20 = vpop.eup %1166 }
 0x289   : > { %v1169_v56 = vpop.eup %1168  ;;  %v725_v23 = vadd.f32 1.0, %v1167_v20  ;;  %v722_v57 = vmul.f32 1.442695, %v707_v19 }
 0x28a   : > { %v724_v24 = vadd.f32 1.0, %v1169_v56 }
 0x28b   : > { %1180 = vlog2.f32 %v725_v23  ;;  %v800_v23 = vadd.s32 4294967288, %v1615_v22 }
 0x28c   : > { %v1171_v25 = vpop.eup %1170  ;;  %1182 = vlog2.f32 %v724_v24  ;;  %v814_v24 = vadd.s32 4294967272, %v1615_v22 }
 0x28d   : > { %v1173_v40 = vpop.eup %1172  ;;  %v728_v45 = vadd.f32 1.0, %v1171_v25  ;;  %1184 = vpow2.f32 %v722_v57  ;;  %v798_v25 = vsub.s32 %v1615_v22, %v1612_v46 }
 0x28e   : > { %v726_v28 = vadd.f32 1.0, %v1173_v40 }
 0x28f   : > { %1186 = vlog2.f32 %v728_v45  ;;  %v817_v45 = vsub.s32 %v814_v24, %v1612_v46 }
 0x290   : > { %v1175_v30 = vpop.eup %1174  ;;  %1188 = vlog2.f32 %v726_v28 }
 0x291   : > { %v1177_v33 = vpop.eup %1176  ;;  %v729_v34 = vadd.f32 1.0, %v1175_v30 }
 0x292   : > { %v727_v35 = vadd.f32 1.0, %v1177_v33 }
 0x293   : > { %1190 = vlog2.f32 %v729_v34 }
 0x294   : > { %v1179_v38 = vpop.eup %1178  ;;  %1192 = vlog2.f32 %v727_v35 }
 0x295   : > { %v730_v39 = vadd.f32 1.0, %v1179_v38 }
 0x297   : > { %1194 = vlog2.f32 %v730_v39 }
 0x298   : > { %v1181_v4 = vpop.eup %1180 }
 0x299   : > { %v1183_v54 = vpop.eup %1182  ;;  %v735_v2 = vmul.f32 0.6931472, %v1181_v4 }
 0x29a   : > { %v1185_v58 = vpop.eup %1184  ;;  %v733_v60 = vmul.f32 0.6931472, %v1183_v54 }
 0x29b   : > { %v749_v61 = vadd.f32 %v735_v2, %v677_v31  ;;  %v731_v3 = vadd.f32 1.0, %v1185_v58 }
 0x29c   : > { %v1187_v62 = vpop.eup %1186  ;;  %v748_v36 = vadd.f32 %v733_v60, %v676_v59 }
 0x29d   : > { %v1189_v37 = vpop.eup %1188  ;;  %v741_v6 = vmul.f32 0.6931472, %v1187_v62  ;;  %1196 = vlog2.f32 %v731_v3  ;;  %v757_v7 = vsub.f32 %v749_v61, %v1632_v41 }
 0x29e   : > { %v737_v8 = vmul.f32 0.6931472, %v1189_v37  ;;  %v756_v47 = vsub.f32 %v748_v36, %v1634_v21  ;;  %v679_v21 = vmax.f32 %v1658_v5, %v1662_v0  ;;  %v683_v0 = vmax.f32 %v1674_v13, %v1676_v52 }
 0x29f   : > { %v752_v42 = vadd.f32 %v741_v6, %v680_v1  ;;  %776 = vperm.xlu1 %1097, %v757_v7   ;;  %v803_v52 = vsub.s32 %v800_v23, %v1612_v46 }
 0x2a0   : > { %v1191_v12 = vpop.eup %1190  ;;  %773 = vperm.xlu0 %1096, %v756_v47   ;;  %v750_v9 = vadd.f32 %v737_v8, %v678_v50 }
 0x2a1   : > { %v1193_v43 = vpop.eup %1192  ;;  %v743_v51 = vmul.f32 0.6931472, %v1191_v12  ;;  %v760_v10 = vsub.f32 %v752_v42, %v1644_v55 }
 0x2a2   : > { %v739_v16 = vmul.f32 0.6931472, %v1193_v43  ;;  %v758_v17 = vsub.f32 %v750_v9, %v1646_v32 }
 0x2a3   : > { %v753_v41 = vadd.f32 %v743_v51, %v681_v49  ;;  %785 = vperm.xlu1 %1097, %v760_v10  }
 0x2a4   : > { %v1195_v29 = vpop.eup %1194  ;;  %v751_v44 = vadd.f32 %v739_v16, %v679_v21 }
 0x2a5   : > { %v745_v14 = vmul.f32 0.6931472, %v1195_v29  ;;  %v761_v15 = vsub.f32 %v753_v41, %v1654_v27 }
 0x2a6   : > { %v759_v18 = vsub.f32 %v751_v44, %v1658_v5 }
 0x2a7   : > { %v754_v63 = vadd.f32 %v745_v14, %v682_v26  ;;  %788 = vperm.xlu0 %1096, %v761_v15   ;;  %779 = vperm.xlu1 %1097, %v758_v17  }
 0x2a9   : > { %v762_v55 = vsub.f32 %v754_v63, %v1668_v11  ;;  %v807_v11 = vadd.s32 4294967280, %v1615_v22 }
 0x2aa   : > { %v1197_v53 = vpop.eup %1196 }
 0x2ab   : > { %v747_v19 = vmul.f32 0.6931472, %v1197_v53  ;;  %791 = vperm.xlu0 %1096, %v762_v55   ;;  %782 = vperm.xlu1 %1097, %v759_v18   ;;  %v810_v40 = vsub.s32 %v807_v11, %v1612_v46 }
 0x2ad   : > { %v755_v48 = vadd.f32 %v747_v19, %v683_v0 }
 0x2af   : > { %v763_v20 = vsub.f32 %v755_v48, %v1674_v13 }
 0x2b1   : > { %794 = vperm.xlu0 %1096, %v763_v20  }
 0x31a   : > { %v777_v27 = vpop.permute.xlu1 %776 }
 0x31b   : > { %v774_v32 = vpop.permute.xlu0 %773  ;;  %v804_v30 = vrot.slane %v777_v27, %v803_v52 }
 0x31c   : > { %v799_v33 = vrot.slane %v774_v32, %v798_v25 }
 0x31e   : > { %v786_v56 = vpop.permute.xlu1 %785  ;;  %v806_v22 = vsel %vm805_vm5, %v804_v30, %v799_v33 }
 0x31f   : > { %v824_v39 = vrot.slane %v786_v56, %v798_v25 }
 0x322   : > { %v780_v57 = vpop.permute.xlu1 %779  ;;  %v789_v5 = vpop.permute.xlu0 %788 }
 0x323   : > { %v828_v34 = vrot.slane %v789_v5, %v803_v52  ;;  %v811_v35 = vrot.slane %v780_v57, %v810_v40 }
 0x325   : > { %v829_v31 = vsel %vm805_vm5, %v828_v34, %v824_v39  ;;  %v813_v58 = vsel %vm812_vm6, %v811_v35, %v806_v22 }
 0x326   : > { %v792_v13 = vpop.permute.xlu0 %791  ;;  %v783_v28 = vpop.permute.xlu1 %782 }
 0x327   : > { %v833_v38 = vrot.slane %v792_v13, %v810_v40  ;;  %v818_v4 = vrot.slane %v783_v28, %v817_v45 }
 0x329   : > { %v834_v46 = vsel %vm812_vm6, %v833_v38, %v829_v31  ;;  %v820_v59 = vsel %vm819_vm7, %v818_v4, %v813_v58 }
 0x32c   : > { %v795_v54 = vpop.permute.xlu0 %794 }
 0x32d   : > { %v838_v2 = vrot.slane %v795_v54, %v817_v45 }
 0x32f   : > { %v839_v60 = vsel %vm819_vm7, %v838_v2, %v834_v46 }
 0x330   : > { %v841_v61 = vsel %vm840_vm8, %v839_v60, %v820_v59 }
 0x331   : > { %v844_v3 = vsel %vm843_vm9, %v841_v61, 0.0 }
 0x332   : > { %845 = vadd.xlane.f32.xlu1 %v844_v3 }
 0x3bb   : > { %v846_v62 = vpop.xlane.xlu1 %845 }
 0x3bc   : > { %v847_v36 = vmul.f32 0.03125, %v846_v62 }
 0x3be   : > { %849 = vst.msk [vmem:[%s205_s23] sm:$0x3] %vm848_vm10, %v847_v36 }
 0x3bf PF: > { %p15_p8 = scmp.ge.s32.totalorder %s1336_s14, 4   ;;  %s1739_s9 = smov %s1284_s10 }
 0x3c0   : > { %s1740_s10 = smov %s1288_s11  ;;  %s1741_s11 = smov %s1346_s17 }
 0x3c1   : > { %s1742_s12 = smov %s1336_s14  ;;  %17 = sbr.rel (!%p15_p8) target bundleno = 5 (0x5), region = 82 }
 0x3c6   :  { %869 = vsyncpa [#allocation3], 1 }
 0x3c7   :  { %871 = vsyncpa [#allocation3 + $0x1], 1 }
 0x3c8   :  { %872 = vsyncpa [#allocation5], 1 }
 0x3c9   :  { %874 = vsyncpa [#allocation5 + $0x1], 1 }

</bundles_post_ra>
